<compile_context>
chip_gen: v7x
topology: tpu7x:2x2x1
jax: 0.10.0
libtpu: 0.0.40
codegen_flags: <defaults>
</compile_context>

<pallas_src>
import functools

import jax
import jax.numpy as jnp
from jax.experimental import pallas as pl
from jax.experimental.pallas import tpu as pltpu


_LANE = 128
_NEG_BIG = -1e30  # plain Python float -> weak-typed literal, NOT a captured jnp constant


def _round_up(v, m):
    return (v + m - 1) // m * m


# -----------------------------------------------------------------------------
# Fused Pallas kernel: log_softmax(A @ relu(A @ (X W1) + b1) @ W2 + b2)
# -----------------------------------------------------------------------------
def _gcn_fused_kernel(a_ref, x_ref, w1_ref, b1_ref, w2_ref, b2_ref, o_ref, *, num_classes):
    a = a_ref[...]                                                  # (Np, Np) bf16

    # ---- layer 1: H = relu(A @ (X @ W1) + b1) -------------------------------
    xw = jnp.dot(x_ref[...], w1_ref[...], preferred_element_type=jnp.float32)
    h = jnp.dot(a, xw.astype(jnp.bfloat16), preferred_element_type=jnp.float32)
    h = jnp.maximum(h + b1_ref[...], 0.0)                           # bias + ReLU epilogue

    # F.dropout(x, training=self.training): eval mode -> identity.
    # TODO(synk): add pltpu.prng_seed/prng_random_bits dropout mask for training parity.

    # ---- layer 2: logits = A @ (H @ W2) + b2 --------------------------------
    hw = jnp.dot(h.astype(jnp.bfloat16), w2_ref[...], preferred_element_type=jnp.float32)
    logits = jnp.dot(a, hw.astype(jnp.bfloat16), preferred_element_type=jnp.float32)
    logits = logits + b2_ref[...]

    # ---- row-wise log_softmax (dim=1), restricted to the real class lanes ---
    col = jax.lax.broadcasted_iota(jnp.int32, logits.shape, dimension=1)
    logits = jnp.where(col < num_classes, logits, _NEG_BIG)         # mask padded lanes
    m = jnp.max(logits, axis=1, keepdims=True)
    z = logits - m
    lse = jnp.log(jnp.sum(jnp.exp(z), axis=1, keepdims=True))
    o_ref[...] = (z - lse).astype(o_ref.dtype)


# -----------------------------------------------------------------------------
# Glue: dense symmetric-normalized adjacency with self-loops (GCN normalization)
# -----------------------------------------------------------------------------
def build_norm_adj(edge_index, num_nodes):
    # NOTE: duplicate edges (if any) are counted with multiplicity, matching PyG's
    # gcn_norm with unit edge weights only when edges are unique.
    src = edge_index[0]
    dst = edge_index[1]
    loop = jnp.arange(num_nodes, dtype=edge_index.dtype)
    src = jnp.concatenate([src, loop])
    dst = jnp.concatenate([dst, loop])
    a = jnp.zeros((num_nodes, num_nodes), jnp.float32).at[dst, src].add(1.0)
    deg = jnp.sum(a, axis=1)
    d_inv_sqrt = jnp.where(deg > 0.0, jax.lax.rsqrt(deg), 0.0)
    return d_inv_sqrt[:, None] * a * d_inv_sqrt[None, :]


# -----------------------------------------------------------------------------
# Wrapper: pad to lane-dense shapes, run one fused pallas_call, crop
# -----------------------------------------------------------------------------
def gcn_forward(params, x, edge_index, num_nodes):
    a_hat = build_norm_adj(edge_index, num_nodes)

    n, f = x.shape
    hid = params["w1"].shape[1]
    ncls = params["w2"].shape[1]

    n_p = _round_up(n, _LANE)   # N appears as both a row (sublane) and contraction/lane dim
    f_p = _round_up(f, _LANE)
    h_p = _round_up(hid, _LANE)
    c_p = _round_up(ncls, _LANE)

    bf16 = jnp.bfloat16
    a_p = jnp.zeros((n_p, n_p), bf16).at[:n, :n].set(a_hat.astype(bf16))
    x_p = jnp.zeros((n_p, f_p), bf16).at[:n, :f].set(x.astype(bf16))
    w1_p = jnp.zeros((f_p, h_p), bf16).at[:f, :hid].set(params["w1"].astype(bf16))
    b1_p = jnp.zeros((1, h_p), jnp.float32).at[:, :hid].set(params["b1"])
    w2_p = jnp.zeros((h_p, c_p), bf16).at[:hid, :ncls].set(params["w2"].astype(bf16))
    b2_p = jnp.zeros((1, c_p), jnp.float32).at[:, :ncls].set(params["b2"])

    kernel = functools.partial(_gcn_fused_kernel, num_classes=ncls)
    out_p = pl.pallas_call(
        kernel,
        out_shape=jax.ShapeDtypeStruct((n_p, c_p), jnp.float32),
        in_specs=[
            pl.BlockSpec((n_p, n_p), lambda: (0, 0)),
            pl.BlockSpec((n_p, f_p), lambda: (0, 0)),
            pl.BlockSpec((f_p, h_p), lambda: (0, 0)),
            pl.BlockSpec((1, h_p), lambda: (0, 0)),
            pl.BlockSpec((h_p, c_p), lambda: (0, 0)),
            pl.BlockSpec((1, c_p), lambda: (0, 0)),
        ],
        out_specs=pl.BlockSpec((n_p, c_p), lambda: (0, 0)),
        # Safe on all generations (<= default scoped budget on v6e/v7x, lifts v5e's 16 MiB);
        # raise further for mid-size graphs on v5e/v6e (128 MiB physical VMEM).
        compiler_params=pltpu.CompilerParams(vmem_limit_bytes=32 * 1024 * 1024),
    )(a_p, x_p, w1_p, b1_p, w2_p, b2_p)

    return out_p[:n, :ncls]


# -----------------------------------------------------------------------------
# Pure-JAX reference (mirrors the kernel's bf16 matmul quantization)
# -----------------------------------------------------------------------------
def _reference_forward(params, x, edge_index, num_nodes):
    f32 = jnp.float32
    a = build_norm_adj(edge_index, num_nodes).astype(jnp.bfloat16)
    xb = x.astype(jnp.bfloat16)
    xw = jnp.dot(xb, params["w1"].astype(jnp.bfloat16), preferred_element_type=f32)
    h = jnp.dot(a, xw.astype(jnp.bfloat16), preferred_element_type=f32)
    h = jnp.maximum(h + params["b1"], 0.0)
    hw = jnp.dot(h.astype(jnp.bfloat16), params["w2"].astype(jnp.bfloat16),
                 preferred_element_type=f32)
    logits = jnp.dot(a, hw.astype(jnp.bfloat16), preferred_element_type=f32) + params["b2"]
    return jax.nn.log_softmax(logits, axis=1)


# -----------------------------------------------------------------------------
# Main
# -----------------------------------------------------------------------------
if __name__ == "__main__":
    # Small synthetic "Planetoid-like" problem.
    num_nodes = 32
    num_features = 32
    hidden = 16
    num_classes = 8
    num_edges = 96

    key = jax.random.PRNGKey(0)
    kx, ke, kw1, kw2 = jax.random.split(key, 4)

    x = jax.random.normal(kx, (num_nodes, num_features), dtype=jnp.float32)
    edge_index = jax.random.randint(
        ke, (2, num_edges), minval=0, maxval=num_nodes, dtype=jnp.int32
    )

    def glorot(k, shape):
        limit = (6.0 / (shape[0] + shape[1])) ** 0.5
        return jax.random.uniform(
            k, shape, minval=-limit, maxval=limit, dtype=jnp.float32
        )

    params = {
        "w1": glorot(kw1, (num_features, hidden)),
        "b1": jnp.zeros((1, hidden), jnp.float32),
        "w2": glorot(kw2, (hidden, num_classes)),
        "b2": jnp.zeros((1, num_classes), jnp.float32),
    }

    out = gcn_forward(params, x, edge_index, num_nodes)
    out = jax.block_until_ready(out)

    assert out.shape == (num_nodes, num_classes)
    # log_softmax rows should sum to ~1 in probability space.
    row_sums = jnp.sum(jnp.exp(out), axis=1)
    assert bool(jnp.all(jnp.abs(row_sums - 1.0) < 1e-3))
    # Match the (bf16-quantized) pure-JAX reference.
    ref = _reference_forward(params, x, edge_index, num_nodes)
    assert bool(jnp.allclose(out, ref, atol=1e-2, rtol=1e-2))

    print("KERNEL_OK")
</pallas_src>

<mosaic_0001>
module attributes {stable_mosaic.version = 11 : i64} {
  func.func @_gcn_fused_kernel(%arg0: memref<128x128xbf16, #tpu.memory_space<vmem>>, %arg1: memref<128x128xbf16, #tpu.memory_space<vmem>>, %arg2: memref<128x128xbf16, #tpu.memory_space<vmem>>, %arg3: memref<1x128xf32, #tpu.memory_space<vmem>>, %arg4: memref<128x128xbf16, #tpu.memory_space<vmem>>, %arg5: memref<1x128xf32, #tpu.memory_space<vmem>>, %arg6: memref<128x128xf32, #tpu.memory_space<vmem>>) attributes {dimension_semantics = [], scalar_prefetch = 0 : i64, scratch_operands = 0 : i64, tpu.core_type = #tpu.core_type<tc>} {
    %c0 = arith.constant 0 : index
    %c0_0 = arith.constant 0 : index
    %0 = vector.load %arg0[%c0, %c0_0] : memref<128x128xbf16, #tpu.memory_space<vmem>>, vector<128x128xbf16>
    %c0_1 = arith.constant 0 : index
    %c0_2 = arith.constant 0 : index
    %1 = vector.load %arg1[%c0_1, %c0_2] : memref<128x128xbf16, #tpu.memory_space<vmem>>, vector<128x128xbf16>
    %c0_3 = arith.constant 0 : index
    %c0_4 = arith.constant 0 : index
    %2 = vector.load %arg2[%c0_3, %c0_4] : memref<128x128xbf16, #tpu.memory_space<vmem>>, vector<128x128xbf16>
    %cst = arith.constant dense<0.000000e+00> : vector<128x128xf32>
    %3 = tpu.matmul %1, %2, %cst {dimension_numbers = #tpu.dot_dimension_numbers<[1], [0], [0], [1], [0, 0, 1, 1], [], []>} : vector<128x128xbf16>, vector<128x128xbf16>, vector<128x128xf32> -> vector<128x128xf32>
    %4 = arith.truncf %3 : vector<128x128xf32> to vector<128x128xbf16>
    %cst_5 = arith.constant dense<0.000000e+00> : vector<128x128xf32>
    %5 = tpu.matmul %0, %4, %cst_5 {dimension_numbers = #tpu.dot_dimension_numbers<[1], [0], [0], [1], [0, 0, 1, 1], [], []>} : vector<128x128xbf16>, vector<128x128xbf16>, vector<128x128xf32> -> vector<128x128xf32>
    %c0_6 = arith.constant 0 : index
    %c0_7 = arith.constant 0 : index
    %6 = vector.load %arg3[%c0_6, %c0_7] : memref<1x128xf32, #tpu.memory_space<vmem>>, vector<1x128xf32>
    %7 = vector.broadcast %6 : vector<1x128xf32> to vector<128x128xf32>
    %8 = arith.addf %5, %7 : vector<128x128xf32>
    %cst_8 = arith.constant 0.000000e+00 : f32
    %9 = vector.broadcast %cst_8 : f32 to vector<128x128xf32>
    %10 = arith.maximumf %8, %9 : vector<128x128xf32>
    %11 = arith.truncf %10 : vector<128x128xf32> to vector<128x128xbf16>
    %c0_9 = arith.constant 0 : index
    %c0_10 = arith.constant 0 : index
    %12 = vector.load %arg4[%c0_9, %c0_10] : memref<128x128xbf16, #tpu.memory_space<vmem>>, vector<128x128xbf16>
    %cst_11 = arith.constant dense<0.000000e+00> : vector<128x128xf32>
    %13 = tpu.matmul %11, %12, %cst_11 {dimension_numbers = #tpu.dot_dimension_numbers<[1], [0], [0], [1], [0, 0, 1, 1], [], []>} : vector<128x128xbf16>, vector<128x128xbf16>, vector<128x128xf32> -> vector<128x128xf32>
    %14 = arith.truncf %13 : vector<128x128xf32> to vector<128x128xbf16>
    %cst_12 = arith.constant dense<0.000000e+00> : vector<128x128xf32>
    %15 = tpu.matmul %0, %14, %cst_12 {dimension_numbers = #tpu.dot_dimension_numbers<[1], [0], [0], [1], [0, 0, 1, 1], [], []>} : vector<128x128xbf16>, vector<128x128xbf16>, vector<128x128xf32> -> vector<128x128xf32>
    %c0_13 = arith.constant 0 : index
    %c0_14 = arith.constant 0 : index
    %16 = vector.load %arg5[%c0_13, %c0_14] : memref<1x128xf32, #tpu.memory_space<vmem>>, vector<1x128xf32>
    %17 = vector.broadcast %16 : vector<1x128xf32> to vector<128x128xf32>
    %18 = arith.addf %15, %17 : vector<128x128xf32>
    %19 = tpu.iota {dimensions = array<i32: 1>} : vector<128x128xi32>
    %c8_i32 = arith.constant 8 : i32
    %20 = vector.broadcast %c8_i32 : i32 to vector<128x128xi32>
    %21 = arith.cmpi slt, %19, %20 : vector<128x128xi32>
    %cst_15 = arith.constant -1.000000e+30 : f32
    %22 = vector.broadcast %cst_15 : f32 to vector<128x128xf32>
    %23 = arith.select %21, %18, %22 : vector<128x128xi1>, vector<128x128xf32>
    %cst_16 = arith.constant dense<0xFF800000> : vector<128xf32>
    %24 = vector.multi_reduction <maximumf>, %23, %cst_16 [1] : vector<128x128xf32> to vector<128xf32>
    %25 = vector.shape_cast %24 : vector<128xf32> to vector<128x1xf32>
    %26 = vector.broadcast %25 : vector<128x1xf32> to vector<128x128xf32>
    %27 = arith.subf %23, %26 : vector<128x128xf32>
    %28 = math.exp %27 : vector<128x128xf32>
    %cst_17 = arith.constant dense<0.000000e+00> : vector<128xf32>
    %29 = vector.multi_reduction <add>, %28, %cst_17 [1] : vector<128x128xf32> to vector<128xf32>
    %30 = vector.shape_cast %29 : vector<128xf32> to vector<128x1xf32>
    %31 = math.log %30 : vector<128x1xf32>
    %32 = vector.broadcast %31 : vector<128x1xf32> to vector<128x128xf32>
    %33 = arith.subf %27, %32 : vector<128x128xf32>
    %c0_18 = arith.constant 0 : index
    %c0_19 = arith.constant 0 : index
    %34 = vector.load %arg6[%c0_18, %c0_19] : memref<128x128xf32, #tpu.memory_space<vmem>>, vector<128x128xf32>
    tpu.vector_store %arg6[%c0_18, %c0_19], %33 {strides = array<i32>} : memref<128x128xf32, #tpu.memory_space<vmem>>, vector<128x128xf32>,
    return
  }
}

</mosaic_0001>

<bundles_post_ra>
// kernel: tpu_custom_call.1
= control target key start
LH: loop header
LB: loop body
LE: loop exit
PB: predicated region body
PF: predicated region fallthrough
CT: control target
= control target key end

     0   :  { %11 = vsyncpa [#allocation3], 0  ;;  %s1732_s0 = inlined_call_operand.hbm [shape: bf16[128,128], index: 0, kind: input, shape index: {}]   ;;  %s1733_s1 = inlined_call_operand.hbm [shape: bf16[128,128], index: 1, kind: input, shape index: {}]   ;;  %s1734_s2 = inlined_call_operand.hbm [shape: bf16[128,128], index: 2, kind: input, shape index: {}]   ;;  %s1735_s3 = inlined_call_operand.vmem [shape: f32[1,128], index: 3, kind: input, shape index: {}]   ;;  %s1736_s4 = inlined_call_operand.hbm [shape: bf16[128,128], index: 4, kind: input, shape index: {}]   ;;  %s1737_s5 = inlined_call_operand.vmem [shape: f32[1,128], index: 5, kind: input, shape index: {}]   ;;  %s1738_s6 = inlined_call_operand.hbm [shape: f32[128,128], index: 6, kind: output, shape index: {}]  }
   0x1   :  { %12 = vsyncpa [#allocation6], 0 }
   0x2   :  { %13 = vsyncpa [#allocation9], 0 }
   0x3   :  { %14 = vsyncpa [#allocation4], 0  ;;  %s1441_s21 = smov [#allocation5]   ;;  %s1442_s23 = smov [#allocation2]  }
   0x4   :  { %s32_s22 = sshll.u32 %s1441_s21, 4  ;;  %s20_s24 = sshll.u32 %s1442_s23, 4  ;;  %s33_s22 = int_to_ptr.vmem [resolvable:$true] %s32_s22  ;;  %s1485_s24 = int_to_ptr.vmem [resolvable:$true] %s20_s24 }
   0x5   :  { %s1323_s27 = scalar_lea.hbm %s1733_s1, 1024 }
   0x6   :  { %p1324_p0 = scmp.ne.s32.totalorder %s1733_s1, %s1323_s27  ;;  %p1327_p1 = scmp.lt.u32.totalorder %s1323_s27, %s1733_s1 }
   0x8   :  { %p1329_p2 = pnand %p1327_p1, %p1324_p0 }
   0xa   :  { %1332 = shalt.err (!%p1329_p2)
}
   0xb   :  { %s1333_s8 = scalar_lea.vmem %s33_s22, 1024  ;;  %p1338_p4 = scmp.lt.s32.totalorder %s33_s22, %s33_s22 }
   0xc   :  { %p1334_p3 = scmp.ne.s32.totalorder %s33_s22, %s1333_s8  ;;  %p1339_p5 = scmp.lt.s32.totalorder %s1333_s8, %s1333_s8 }
   0xe   :  { %p1340_p6 = por %p1339_p5, %p1338_p4 }
  0x10   :  { %p1341_p7 = pnand %p1340_p6, %p1334_p3 }
  0x12   :  { %1344 = shalt.err (!%p1341_p7)
}
  0x13   :  { %s1443_s9 = smov 64   ;;  %s1444_s10 = smov 4  }
  0x14   :  { %38 = dma.hbm_to_vmem [thread:$0]  %s1733_s1, 1024, %s33_s22, [#allocation6], %s1443_s9, %s1443_s9, %s1444_s10  }
  0x15   :  { %s1345_s15 = scalar_lea.hbm %s1732_s0, 1024 }
  0x16   :  { %p1346_p8 = scmp.ne.s32.totalorder %s1732_s0, %s1345_s15  ;;  %p1349_p9 = scmp.lt.u32.totalorder %s1345_s15, %s1732_s0 }
  0x18   :  { %p1351_p10 = pnand %p1349_p9, %p1346_p8 }
  0x1a   :  { %1354 = shalt.err (!%p1351_p10)
}
  0x1b   :  { %s1355_s20 = scalar_lea.vmem %s1485_s24, 1024  ;;  %p1360_p12 = scmp.lt.s32.totalorder %s1485_s24, %s1485_s24 }
  0x1c   :  { %p1356_p11 = scmp.ne.s32.totalorder %s1485_s24, %s1355_s20  ;;  %p1361_p13 = scmp.lt.s32.totalorder %s1355_s20, %s1355_s20 }
  0x1e   :  { %p1362_p0 = por %p1361_p13, %p1360_p12 }
  0x20   :  { %p1363_p1 = pnand %p1362_p0, %p1356_p11 }
  0x22   :  { %1366 = shalt.err (!%p1363_p1)
}
  0x23   :  { %26 = dma.hbm_to_vmem [thread:$0]  %s1732_s0, 1024, %s1485_s24, [#allocation3], %s1443_s9, %s1443_s9, %s1444_s10  }
  0x24   :  { %s1445_s22 = smov [#allocation7]   ;;  %s1446_s25 = smov [#allocation8]  }
  0x25   :  { %s44_s23 = sshll.u32 %s1445_s22, 4  ;;  %s58_s26 = sshll.u32 %s1446_s25, 4  ;;  %s45_s23 = int_to_ptr.vmem [resolvable:$true] %s44_s23  ;;  %s1522_s26 = int_to_ptr.vmem [resolvable:$true] %s58_s26 }
  0x26   :  { %s1367_s29 = scalar_lea.hbm %s1734_s2, 1024 }
  0x27   :  { %p1368_p2 = scmp.ne.s32.totalorder %s1734_s2, %s1367_s29  ;;  %p1371_p3 = scmp.lt.u32.totalorder %s1367_s29, %s1734_s2 }
  0x29   :  { %p1373_p4 = pnand %p1371_p3, %p1368_p2 }
  0x2b   :  { %1376 = shalt.err (!%p1373_p4)
}
  0x2c   :  { %s1377_s0 = scalar_lea.vmem %s45_s23, 1024  ;;  %p1382_p6 = scmp.lt.s32.totalorder %s45_s23, %s45_s23 }
  0x2d   :  { %p1378_p5 = scmp.ne.s32.totalorder %s45_s23, %s1377_s0  ;;  %p1383_p7 = scmp.lt.s32.totalorder %s1377_s0, %s1377_s0 }
  0x2f   :  { %p1384_p8 = por %p1383_p7, %p1382_p6 }
  0x31   :  { %p1385_p9 = pnand %p1384_p8, %p1378_p5 }
  0x33   :  { %1388 = shalt.err (!%p1385_p9)
}
  0x34   :  { %50 = dma.hbm_to_vmem [thread:$0]  %s1734_s2, 1024, %s45_s23, [#allocation6], %s1443_s9, %s1443_s9, %s1444_s10  }
  0x35   :  { %s1389_s15 = scalar_lea.hbm %s1736_s4, 1024 }
  0x36   :  { %p1390_p10 = scmp.ne.s32.totalorder %s1736_s4, %s1389_s15  ;;  %p1393_p11 = scmp.lt.u32.totalorder %s1389_s15, %s1736_s4 }
  0x38   :  { %p1395_p12 = pnand %p1393_p11, %p1390_p10 }
  0x3a   :  { %1398 = shalt.err (!%p1395_p12)
}
  0x3b   :  { %s1399_s20 = scalar_lea.vmem %s1522_s26, 1024  ;;  %p1404_p0 = scmp.lt.s32.totalorder %s1522_s26, %s1522_s26 }
  0x3c   :  { %p1400_p13 = scmp.ne.s32.totalorder %s1522_s26, %s1399_s20  ;;  %p1405_p1 = scmp.lt.s32.totalorder %s1399_s20, %s1399_s20 }
  0x3e   :  { %p1406_p2 = por %p1405_p1, %p1404_p0 }
  0x40   :  { %p1407_p3 = pnand %p1406_p2, %p1400_p13 }
  0x42   :  { %1410 = shalt.err (!%p1407_p3)
}
  0x43   :  { %64 = dma.hbm_to_vmem [thread:$0]  %s1736_s4, 1024, %s1522_s26, [#allocation9], %s1443_s9, %s1443_s9, %s1444_s10  }
  0x44   :  { %1433 = dma.done.wait [#allocation3], 1024  }
  0x45   :  { %1434 = vsyncadd [#allocation3], 4294966272 }
  0x46   :  { %1435 = dma.done.wait [#allocation6], 2048  }
  0x47   :  { %1436 = vsyncadd [#allocation6], 4294965248 }
  0x48   :  { %1437 = dma.done.wait [#allocation9], 1024  }
  0x49   :  { %1438 = vsyncadd [#allocation9], 4294966272  ;;  %v1227_v0 = vld [vmem:[#allocation7] sm:$0xff]   ;;  %v1228_v1 = vld [vmem:[#allocation7 + $0x8] sm:$0xff]  }
  0x4a   :  { %1090 = vmatprep.subr.bf16.mxu0 %v1227_v0  ;;  %v1229_v2 = vld [vmem:[#allocation7 + $0x10] sm:$0xff]   ;;  %v1230_v3 = vld [vmem:[#allocation7 + $0x18] sm:$0xff]   ;;  %v1235_v4 = vld [vmem:[#allocation5] sm:$0xff]  }
  0x4b   :  { %1091 = vmatpush3.bf16.msra.mxu0 %v1227_v0  ;;  %1106 = vmatprep.mubr.bf16.mxu0 %v1235_v4  ;;  %v1231_v5 = vld [vmem:[#allocation7 + $0x20] sm:$0xff]   ;;  %v1232_v6 = vld [vmem:[#allocation7 + $0x28] sm:$0xff]   ;;  %v1233_v7 = vld [vmem:[#allocation7 + $0x30] sm:$0xff]  }
  0x4c   :  { %1092 = vmatprep.subr.bf16.mxu0 %v1228_v1  ;;  %v1234_v8 = vld [vmem:[#allocation7 + $0x38] sm:$0xff]   ;;  %v1236_v9 = vld [vmem:[#allocation5 + $0x8] sm:$0xff]   ;;  %v1237_v10 = vld [vmem:[#allocation5 + $0x10] sm:$0xff]  }
  0x4d   :  { %v1238_v11 = vld [vmem:[#allocation5 + $0x18] sm:$0xff]   ;;  %v1239_v12 = vld [vmem:[#allocation5 + $0x20] sm:$0xff]   ;;  %v1240_v13 = vld [vmem:[#allocation5 + $0x28] sm:$0xff]  }
  0x4e   :  { %v1241_v14 = vld [vmem:[#allocation5 + $0x30] sm:$0xff]   ;;  %v1242_v15 = vld [vmem:[#allocation5 + $0x38] sm:$0xff]   ;;  %v1559_v16 = vld [vmem:[#allocation2] sm:$0xff]  }
  0x4f   :  { %1093 = vmatpush3.bf16.msra.mxu0 %v1228_v1  ;;  %1138 = vmatprep.mubr.bf16.mxu1 %v1559_v16  ;;  %v1251_v17 = vld [vmem:[#allocation8] sm:$0xff]   ;;  %v1252_v18 = vld [vmem:[#allocation8 + $0x8] sm:$0xff]   ;;  %v1253_v19 = vld [vmem:[#allocation8 + $0x10] sm:$0xff]  }
  0x50   :  { %1094 = vmatprep.subr.bf16.mxu0 %v1229_v2  ;;  %v1254_v20 = vld [vmem:[#allocation8 + $0x18] sm:$0xff]   ;;  %v1255_v21 = vld [vmem:[#allocation8 + $0x20] sm:$0xff]   ;;  %v1256_v22 = vld [vmem:[#allocation8 + $0x28] sm:$0xff]  }
  0x51   :  { %v1562_v47 = vld [vmem:[#allocation2 + $0x8] sm:$0xff]   ;;  %v1564_v48 = vld [vmem:[#allocation2 + $0x10] sm:$0xff]   ;;  %v1568_v49 = vld [vmem:[#allocation2 + $0x18] sm:$0xff]  }
  0x52   :  { %v1570_v50 = vld [vmem:[#allocation2 + $0x20] sm:$0xff]   ;;  %v1574_v51 = vld [vmem:[#allocation2 + $0x28] sm:$0xff]   ;;  %v1576_v52 = vld [vmem:[#allocation2 + $0x30] sm:$0xff]  }
  0x53   :  { %1095 = vmatpush3.bf16.msra.mxu0 %v1229_v2  ;;  %v1580_v53 = vld [vmem:[#allocation2 + $0x38] sm:$0xff]   ;;  %v1257_v54 = vld [vmem:[#allocation8 + $0x30] sm:$0xff]   ;;  %v1008_v56 = vld [vmem:[%s1735_s3] ss:$0 sm:$0xff] }
  0x54   :  { %1096 = vmatprep.subr.bf16.mxu0 %v1230_v3  ;;  %v1258_v55 = vld [vmem:[#allocation8 + $0x38] sm:$0xff]  }
  0x57   :  { %1097 = vmatpush3.bf16.msra.mxu0 %v1230_v3 }
  0x58   :  { %1098 = vmatprep.subr.bf16.mxu0 %v1231_v5 }
  0x5b   :  { %1099 = vmatpush3.bf16.msra.mxu0 %v1231_v5 }
  0x5c   :  { %1100 = vmatprep.subr.bf16.mxu0 %v1232_v6 }
  0x5f   :  { %1101 = vmatpush3.bf16.msra.mxu0 %v1232_v6 }
  0x60   :  { %1102 = vmatprep.subr.bf16.mxu0 %v1233_v7 }
  0x63   :  { %1103 = vmatpush3.bf16.msra.mxu0 %v1233_v7 }
  0x64   :  { %1104 = vmatprep.subr.bf16.mxu0 %v1234_v8 }
  0x67   :  { %1105 = vmatpush3.bf16.msra.mxu0 %v1234_v8 }
  0x68   :  { %1154 = vmatprep.subr.bf16.mxu0 %v1251_v17 }
  0x6a   :  { %1107 = vmatmul.mubr.bf16.vlgmr.msra.gmra.mrb[0].mxu0 %v1236_v9 }
  0x6b   :  { %1110 = vmatprep.mubr.bf16.mxu0 %v1237_v10  ;;  %1155 = vmatpush3.bf16.msra.mxu0 %v1251_v17 }
  0x6c   :  { %1156 = vmatprep.subr.bf16.mxu0 %v1252_v18 }
  0x6f   :  { %1157 = vmatpush3.bf16.msra.mxu0 %v1252_v18 }
  0x70   :  { %1158 = vmatprep.subr.bf16.mxu0 %v1253_v19 }
  0x72   :  { %1111 = vmatmul.mubr.bf16.gmra.mrb[4].mxu0 %v1238_v11 }
  0x73   :  { %1114 = vmatprep.mubr.bf16.mxu0 %v1239_v12  ;;  %1159 = vmatpush3.bf16.msra.mxu0 %v1253_v19 }
  0x74   :  { %1160 = vmatprep.subr.bf16.mxu0 %v1254_v20 }
  0x77   :  { %1161 = vmatpush3.bf16.msra.mxu0 %v1254_v20 }
  0x78   :  { %1162 = vmatprep.subr.bf16.mxu0 %v1255_v21 }
  0x7a   :  { %1115 = vmatmul.mubr.bf16.gmra.mrb[8].mxu0 %v1240_v13 }
  0x7b   :  { %1118 = vmatprep.mubr.bf16.mxu0 %v1241_v14  ;;  %1163 = vmatpush3.bf16.msra.mxu0 %v1255_v21 }
  0x7c   :  { %1164 = vmatprep.subr.bf16.mxu0 %v1256_v22 }
  0x7f   :  { %1165 = vmatpush3.bf16.msra.mxu0 %v1256_v22 }
  0x80   :  { %1166 = vmatprep.subr.bf16.mxu0 %v1257_v54 }
  0x82   :  { %1119 = vmatmul.mubr.bf16.gmra.mrb[12].mxu0 %v1242_v15 }
  0x83   :  { %1167 = vmatpush3.bf16.msra.mxu0 %v1257_v54 }
  0x84   :  { %1168 = vmatprep.subr.bf16.mxu0 %v1258_v55 }
  0x87   :  { %1169 = vmatpush3.bf16.msra.mxu0 %v1258_v55 }
 0x13d   :  { %v1108_v23 = vpop.f32.mrb[0].mxu0 }
 0x13e   :  { %v258_v24 = vpop.f32.mrb[1].mxu0 }
 0x13f   :  { %v1109_v25 = vpop.f32.mrb[2].mxu0 }
 0x140   :  { %v322_v26 = vpack.c.bf16 %v1109_v25, %v1108_v23  ;;  %v261_v27 = vpop.f32.mrb[3].mxu0 }
 0x141   :  { %v321_v28 = vpack.c.bf16 %v261_v27, %v258_v24 }
 0x143   :  { %1122 = vmatprep.subr.bf16.mxu1 %v321_v28 }
 0x144   :  { %1123 = vmatpush3.bf16.msra.mxu1 %v321_v28 }
 0x145   :  { %v1112_v29 = vpop.f32.mrb[4].mxu0  ;;  %1124 = vmatprep.subr.bf16.mxu1 %v322_v26 }
 0x146   :  { %v274_v30 = vpop.f32.mrb[5].mxu0 }
 0x147   :  { %v1113_v31 = vpop.f32.mrb[6].mxu0 }
 0x148   :  { %v324_v32 = vpack.c.bf16 %v1113_v31, %v1112_v29  ;;  %v277_v33 = vpop.f32.mrb[7].mxu0  ;;  %1125 = vmatpush3.bf16.msra.mxu1 %v322_v26 }
 0x149   :  { %v323_v34 = vpack.c.bf16 %v277_v33, %v274_v30 }
 0x14b   :  { %1126 = vmatprep.subr.bf16.mxu1 %v323_v34 }
 0x14c   :  { %1127 = vmatpush3.bf16.msra.mxu1 %v323_v34 }
 0x14d   :  { %v1116_v35 = vpop.f32.mrb[8].mxu0  ;;  %1128 = vmatprep.subr.bf16.mxu1 %v324_v32 }
 0x14e   :  { %v290_v36 = vpop.f32.mrb[9].mxu0 }
 0x14f   :  { %v1117_v37 = vpop.f32.mrb[10].mxu0 }
 0x150   :  { %v326_v38 = vpack.c.bf16 %v1117_v37, %v1116_v35  ;;  %v293_v39 = vpop.f32.mrb[11].mxu0  ;;  %1129 = vmatpush3.bf16.msra.mxu1 %v324_v32 }
 0x151   :  { %v325_v40 = vpack.c.bf16 %v293_v39, %v290_v36 }
 0x153   :  { %1130 = vmatprep.subr.bf16.mxu1 %v325_v40 }
 0x154   :  { %1131 = vmatpush3.bf16.msra.mxu1 %v325_v40 }
 0x155   :  { %v1120_v41 = vpop.f32.mrb[12].mxu0  ;;  %1132 = vmatprep.subr.bf16.mxu1 %v326_v38 }
 0x156   :  { %v306_v42 = vpop.f32.mrb[13].mxu0 }
 0x157   :  { %v1121_v43 = vpop.f32.mrb[14].mxu0 }
 0x158   :  { %v328_v44 = vpack.c.bf16 %v1121_v43, %v1120_v41  ;;  %v309_v45 = vpop.f32.mrb[15].mxu0  ;;  %1133 = vmatpush3.bf16.msra.mxu1 %v326_v38 }
 0x159   :  { %v327_v46 = vpack.c.bf16 %v309_v45, %v306_v42 }
 0x15b   :  { %1134 = vmatprep.subr.bf16.mxu1 %v327_v46 }
 0x15c   :  { %1135 = vmatpush3.bf16.msra.mxu1 %v327_v46 }
 0x15d   :  { %1136 = vmatprep.subr.bf16.mxu1 %v328_v44 }
 0x160   :  { %1137 = vmatpush3.bf16.msra.mxu1 %v328_v44 }
 0x163   :  { %1139 = vmatmul.mubr.bf16.vlgmr.msra.gmra.mrb[0].mxu1 %v1562_v47 }
 0x164   :  { %1142 = vmatprep.mubr.bf16.mxu1 %v1564_v48 }
 0x16b   :  { %1143 = vmatmul.mubr.bf16.gmra.mrb[4].mxu1 %v1568_v49 }
 0x16c   :  { %1146 = vmatprep.mubr.bf16.mxu1 %v1570_v50 }
 0x173   :  { %1147 = vmatmul.mubr.bf16.gmra.mrb[8].mxu1 %v1574_v51 }
 0x174   :  { %1150 = vmatprep.mubr.bf16.mxu1 %v1576_v52 }
 0x17b   :  { %1151 = vmatmul.mubr.bf16.gmra.mrb[12].mxu1 %v1580_v53 }
 0x17c   :  { %1202 = vmatprep.mubr.bf16.mxu1 %v1559_v16 }
 0x236   :  { %v1140_v57 = vpop.f32.mrb[0].mxu1 }
 0x237   :  { %v427_v58 = vadd.f32 %v1140_v57, %v1008_v56  ;;  %v418_v59 = vpop.f32.mrb[1].mxu1 }
 0x238   :  { %v419_v60 = vadd.f32 %v1008_v56, %v418_v59  ;;  %v1141_v61 = vpop.f32.mrb[2].mxu1 }
 0x239   :  { %v430_v62 = vadd.f32 %v1141_v61, %v1008_v56  ;;  %v421_v63 = vpop.f32.mrb[3].mxu1  ;;  %v483_v1 = vmax.f32 %v427_v58, 0.0 }
 0x23a   :  { %v422_v0 = vadd.f32 %v1008_v56, %v421_v63  ;;  %v481_v3 = vmax.f32 %v419_v60, 0.0 }
 0x23b   :  { %v484_v2 = vmax.f32 %v430_v62, 0.0 }
 0x23c   :  { %v482_v4 = vmax.f32 %v422_v0, 0.0 }
 0x23d   :  { %v498_v5 = vpack.c.bf16 %v484_v2, %v483_v1 }
 0x23e   :  { %v497_v6 = vpack.c.bf16 %v482_v4, %v481_v3  ;;  %v1144_v7 = vpop.f32.mrb[4].mxu1 }
 0x23f   :  { %v443_v8 = vadd.f32 %v1144_v7, %v1008_v56  ;;  %v434_v9 = vpop.f32.mrb[5].mxu1 }
 0x240   :  { %v435_v10 = vadd.f32 %v1008_v56, %v434_v9  ;;  %v1145_v11 = vpop.f32.mrb[6].mxu1  ;;  %1170 = vmatprep.mubr.bf16.mxu0 %v497_v6 }
 0x241   :  { %v446_v12 = vadd.f32 %v1145_v11, %v1008_v56  ;;  %v437_v13 = vpop.f32.mrb[7].mxu1  ;;  %1171 = vmatmul.mubr.bf16.vlgmr.msra.gmra.mrb[16].mxu0 %v498_v5  ;;  %v487_v15 = vmax.f32 %v443_v8, 0.0 }
 0x242   :  { %v438_v14 = vadd.f32 %v1008_v56, %v437_v13  ;;  %v485_v17 = vmax.f32 %v435_v10, 0.0 }
 0x243   :  { %v488_v16 = vmax.f32 %v446_v12, 0.0 }
 0x244   :  { %v486_v18 = vmax.f32 %v438_v14, 0.0 }
 0x245   :  { %v500_v19 = vpack.c.bf16 %v488_v16, %v487_v15  ;;  %v778_v16 = vlaneseq }
 0x246   :  { %v499_v20 = vpack.c.bf16 %v486_v18, %v485_v17  ;;  %v1148_v21 = vpop.f32.mrb[8].mxu1  ;;  %v1025_v18 = vld [vmem:[%s1737_s5] ss:$0 sm:$0xff]  ;;  %s1447_s5 = smov [#allocation10]  }
 0x247   :  { %v459_v22 = vadd.f32 %v1148_v21, %v1008_v56  ;;  %v450_v23 = vpop.f32.mrb[9].mxu1  ;;  %v1594_v17 = vand.u32 127, %v778_v16  ;;  %s978_s21 = sshll.u32 %s1447_s5, 4  ;;  %s979_s21 = int_to_ptr.vmem [resolvable:$true] %s978_s21 }
 0x248   :  { %v451_v24 = vadd.f32 %v1008_v56, %v450_v23  ;;  %v1149_v25 = vpop.f32.mrb[10].mxu1  ;;  %1174 = vmatprep.mubr.bf16.mxu0 %v499_v20  ;;  %s1411_s22 = scalar_lea.vmem %s979_s21, 2048  ;;  %p1416_p5 = scmp.lt.s32.totalorder %s979_s21, %s979_s21 }
 0x249   :  { %v462_v26 = vadd.f32 %v1149_v25, %v1008_v56  ;;  %v453_v27 = vpop.f32.mrb[11].mxu1  ;;  %1175 = vmatmul.mubr.bf16.gmra.mrb[20].mxu0 %v500_v19  ;;  %v491_v29 = vmax.f32 %v459_v22, 0.0  ;;  %vm780_vm0 = vcmp.lt.s32.totalorder %v1594_v17, 8  ;;  %p1412_p4 = scmp.ne.s32.totalorder %s979_s21, %s1411_s22  ;;  %p1417_p6 = scmp.lt.s32.totalorder %s1411_s22, %s1411_s22 }
 0x24a   :  { %v454_v28 = vadd.f32 %v1008_v56, %v453_v27  ;;  %v489_v31 = vmax.f32 %v451_v24, 0.0 }
 0x24b   :  { %v492_v30 = vmax.f32 %v462_v26, 0.0  ;;  %p1418_p7 = por %p1417_p6, %p1416_p5 }
 0x24c   :  { %v490_v32 = vmax.f32 %v454_v28, 0.0 }
 0x24d   :  { %v502_v33 = vpack.c.bf16 %v492_v30, %v491_v29  ;;  %p1419_p8 = pnand %p1418_p7, %p1412_p4 }
 0x24e   :  { %v501_v34 = vpack.c.bf16 %v490_v32, %v489_v31  ;;  %v1152_v35 = vpop.f32.mrb[12].mxu1 }
 0x24f   :  { %v475_v36 = vadd.f32 %v1152_v35, %v1008_v56  ;;  %v466_v37 = vpop.f32.mrb[13].mxu1 }
 0x250   :  { %v467_v38 = vadd.f32 %v1008_v56, %v466_v37  ;;  %v1153_v39 = vpop.f32.mrb[14].mxu1  ;;  %1178 = vmatprep.mubr.bf16.mxu0 %v501_v34 }
 0x251   :  { %v478_v40 = vadd.f32 %v1153_v39, %v1008_v56  ;;  %v469_v41 = vpop.f32.mrb[15].mxu1  ;;  %1179 = vmatmul.mubr.bf16.gmra.mrb[24].mxu0 %v502_v33  ;;  %v495_v43 = vmax.f32 %v475_v36, 0.0 }
 0x252   :  { %v470_v42 = vadd.f32 %v1008_v56, %v469_v41  ;;  %v493_v45 = vmax.f32 %v467_v38, 0.0 }
 0x253   :  { %v496_v44 = vmax.f32 %v478_v40, 0.0 }
 0x254   :  { %v494_v46 = vmax.f32 %v470_v42, 0.0 }
 0x255   :  { %v504_v54 = vpack.c.bf16 %v496_v44, %v495_v43 }
 0x256   :  { %v503_v55 = vpack.c.bf16 %v494_v46, %v493_v45 }
 0x258   :  { %1182 = vmatprep.mubr.bf16.mxu0 %v503_v55 }
 0x259   :  { %1183 = vmatmul.mubr.bf16.gmra.mrb[28].mxu0 %v504_v54 }
 0x314   :  { %v1172_v57 = vpop.f32.mrb[16].mxu0 }
 0x315   :  { %v603_v58 = vpop.f32.mrb[17].mxu0 }
 0x316   :  { %v1173_v59 = vpop.f32.mrb[18].mxu0 }
 0x317   :  { %v667_v60 = vpack.c.bf16 %v1173_v59, %v1172_v57  ;;  %v606_v61 = vpop.f32.mrb[19].mxu0 }
 0x318   :  { %v666_v62 = vpack.c.bf16 %v606_v61, %v603_v58 }
 0x31a   :  { %1186 = vmatprep.subr.bf16.mxu1 %v666_v62 }
 0x31b   :  { %1187 = vmatpush3.bf16.msra.mxu1 %v666_v62 }
 0x31c   :  { %v1176_v63 = vpop.f32.mrb[20].mxu0  ;;  %1188 = vmatprep.subr.bf16.mxu1 %v667_v60 }
 0x31d   :  { %v619_v0 = vpop.f32.mrb[21].mxu0 }
 0x31e   :  { %v1177_v56 = vpop.f32.mrb[22].mxu0 }
 0x31f   :  { %v669_v1 = vpack.c.bf16 %v1177_v56, %v1176_v63  ;;  %v622_v2 = vpop.f32.mrb[23].mxu0  ;;  %1189 = vmatpush3.bf16.msra.mxu1 %v667_v60 }
 0x320   :  { %v668_v3 = vpack.c.bf16 %v622_v2, %v619_v0 }
 0x322   :  { %1190 = vmatprep.subr.bf16.mxu1 %v668_v3 }
 0x323   :  { %1191 = vmatpush3.bf16.msra.mxu1 %v668_v3 }
 0x324   :  { %v1180_v4 = vpop.f32.mrb[24].mxu0  ;;  %1192 = vmatprep.subr.bf16.mxu1 %v669_v1 }
 0x325   :  { %v635_v5 = vpop.f32.mrb[25].mxu0 }
 0x326   :  { %v1181_v6 = vpop.f32.mrb[26].mxu0 }
 0x327   :  { %v671_v7 = vpack.c.bf16 %v1181_v6, %v1180_v4  ;;  %v638_v8 = vpop.f32.mrb[27].mxu0  ;;  %1193 = vmatpush3.bf16.msra.mxu1 %v669_v1 }
 0x328   :  { %v670_v9 = vpack.c.bf16 %v638_v8, %v635_v5 }
 0x32a   :  { %1194 = vmatprep.subr.bf16.mxu1 %v670_v9 }
 0x32b   :  { %1195 = vmatpush3.bf16.msra.mxu1 %v670_v9 }
 0x32c   :  { %v1184_v10 = vpop.f32.mrb[28].mxu0  ;;  %1196 = vmatprep.subr.bf16.mxu1 %v671_v7 }
 0x32d   :  { %v651_v11 = vpop.f32.mrb[29].mxu0 }
 0x32e   :  { %v1185_v12 = vpop.f32.mrb[30].mxu0 }
 0x32f   :  { %v673_v13 = vpack.c.bf16 %v1185_v12, %v1184_v10  ;;  %v654_v14 = vpop.f32.mrb[31].mxu0  ;;  %1197 = vmatpush3.bf16.msra.mxu1 %v671_v7 }
 0x330   :  { %v672_v15 = vpack.c.bf16 %v654_v14, %v651_v11 }
 0x332   :  { %1198 = vmatprep.subr.bf16.mxu1 %v672_v15 }
 0x333   :  { %1199 = vmatpush3.bf16.msra.mxu1 %v672_v15 }
 0x334   :  { %1200 = vmatprep.subr.bf16.mxu1 %v673_v13 }
 0x337   :  { %1201 = vmatpush3.bf16.msra.mxu1 %v673_v13 }
 0x33a   :  { %1203 = vmatmul.mubr.bf16.vlgmr.msra.gmra.mrb[16].mxu1 %v1562_v47 }
 0x33b   :  { %1206 = vmatprep.mubr.bf16.mxu1 %v1564_v48 }
 0x342   :  { %1207 = vmatmul.mubr.bf16.gmra.mrb[20].mxu1 %v1568_v49 }
 0x343   :  { %1210 = vmatprep.mubr.bf16.mxu1 %v1570_v50 }
 0x34a   :  { %1211 = vmatmul.mubr.bf16.gmra.mrb[24].mxu1 %v1574_v51 }
 0x34b   :  { %1214 = vmatprep.mubr.bf16.mxu1 %v1576_v52 }
 0x352   :  { %1215 = vmatmul.mubr.bf16.gmra.mrb[28].mxu1 %v1580_v53 }
 0x40d   :  { %v1204_v47 = vpop.f32.mrb[16].mxu1 }
 0x40e   :  { %v724_v48 = vadd.f32 %v1204_v47, %v1025_v18  ;;  %v715_v49 = vpop.f32.mrb[17].mxu1 }
 0x40f   :  { %v716_v19 = vadd.f32 %v1025_v18, %v715_v49  ;;  %v1205_v50 = vpop.f32.mrb[18].mxu1 }
 0x410   :  { %v727_v20 = vadd.f32 %v1205_v50, %v1025_v18  ;;  %v718_v51 = vpop.f32.mrb[19].mxu1  ;;  %v783_v52 = vsel %vm780_vm0, %v724_v48, -1e+30 }
 0x411   :  { %v719_v53 = vadd.f32 %v1025_v18, %v718_v51  ;;  %801 = vmax.xlane.f32.xlu1 %v783_v52  ;;  %v781_v21 = vsel %vm780_vm0, %v716_v19, -1e+30 }
 0x412   :  { %797 = vmax.xlane.f32.xlu0 %v781_v21  ;;  %v784_v22 = vsel %vm780_vm0, %v727_v20, -1e+30 }
 0x413   :  { %v782_v24 = vsel %vm780_vm0, %v719_v53, -1e+30 }
 0x415   :  { %803 = vmax.xlane.f32.xlu1 %v784_v22  ;;  %v1208_v23 = vpop.f32.mrb[20].mxu1 }
 0x416   :  { %v740_v25 = vadd.f32 %v1208_v23, %v1025_v18  ;;  %v731_v26 = vpop.f32.mrb[21].mxu1  ;;  %799 = vmax.xlane.f32.xlu0 %v782_v24 }
 0x417   :  { %v1209_v27 = vpop.f32.mrb[22].mxu1  ;;  %v732_v31 = vadd.f32 %v1025_v18, %v731_v26 }
 0x418   :  { %v743_v28 = vadd.f32 %v1209_v27, %v1025_v18  ;;  %v734_v29 = vpop.f32.mrb[23].mxu1  ;;  %v787_v30 = vsel %vm780_vm0, %v740_v25, -1e+30 }
 0x419   :  { %v735_v32 = vadd.f32 %v1025_v18, %v734_v29  ;;  %v785_v35 = vsel %vm780_vm0, %v732_v31, -1e+30 }
 0x41a   :  { %809 = vmax.xlane.f32.xlu0 %v787_v30  ;;  %v788_v33 = vsel %vm780_vm0, %v743_v28, -1e+30 }
 0x41b   :  { %811 = vmax.xlane.f32.xlu1 %v788_v33  ;;  %v786_v38 = vsel %vm780_vm0, %v735_v32, -1e+30 }
 0x41d   :  { %v1212_v34 = vpop.f32.mrb[24].mxu1 }
 0x41e   :  { %v756_v36 = vadd.f32 %v1212_v34, %v1025_v18  ;;  %v747_v37 = vpop.f32.mrb[25].mxu1  ;;  %805 = vmax.xlane.f32.xlu0 %v785_v35 }
 0x41f   :  { %v1213_v39 = vpop.f32.mrb[26].mxu1  ;;  %807 = vmax.xlane.f32.xlu1 %v786_v38  ;;  %v748_v43 = vadd.f32 %v1025_v18, %v747_v37 }
 0x420   :  { %v759_v40 = vadd.f32 %v1213_v39, %v1025_v18  ;;  %v750_v41 = vpop.f32.mrb[27].mxu1  ;;  %v791_v42 = vsel %vm780_vm0, %v756_v36, -1e+30 }
 0x421   :  { %v751_v44 = vadd.f32 %v1025_v18, %v750_v41  ;;  %v1622_v54 = vsel %vm780_vm0, %v748_v43, -1e+30 }
 0x422   :  { %817 = vmax.xlane.f32.xlu0 %v791_v42  ;;  %v792_v45 = vsel %vm780_vm0, %v759_v40, -1e+30 }
 0x423   :  { %819 = vmax.xlane.f32.xlu1 %v792_v45  ;;  %v1627_v57 = vsel %vm780_vm0, %v751_v44, -1e+30 }
 0x425   :  { %v1216_v46 = vpop.f32.mrb[28].mxu1 }
 0x426   :  { %v763_v55 = vpop.f32.mrb[29].mxu1  ;;  %813 = vmax.xlane.f32.xlu0 %v1622_v54  ;;  %v772_v61 = vadd.f32 %v1216_v46, %v1025_v18 }
 0x427   :  { %v764_v58 = vadd.f32 %v1025_v18, %v763_v55  ;;  %v1217_v59 = vpop.f32.mrb[30].mxu1  ;;  %815 = vmax.xlane.f32.xlu1 %v1627_v57 }
 0x428   :  { %v766_v60 = vpop.f32.mrb[31].mxu1  ;;  %v775_v0 = vadd.f32 %v1217_v59, %v1025_v18  ;;  %v1642_v1 = vsel %vm780_vm0, %v772_v61, -1e+30 }
 0x429   :  { %v767_v62 = vadd.f32 %v1025_v18, %v766_v60  ;;  %v1632_v63 = vsel %vm780_vm0, %v764_v58, -1e+30 }
 0x42a   :  { %821 = vmax.xlane.f32.xlu0 %v1632_v63  ;;  %v1647_v2 = vsel %vm780_vm0, %v775_v0, -1e+30 }
 0x42b   :  { %v1637_v56 = vsel %vm780_vm0, %v767_v62, -1e+30 }
 0x42c   :  { %823 = vmax.xlane.f32.xlu1 %v1637_v56 }
 0x42e   :  { %825 = vmax.xlane.f32.xlu0 %v1642_v1 }
 0x430   :  { %827 = vmax.xlane.f32.xlu1 %v1647_v2 }
 0x49e   :  { %v802_v3 = vpop.xlane.xlu1 %801 }
 0x49f   :  { %v1650_v4 = vsub.f32 %v783_v52, %v802_v3  ;;  %v798_v5 = vpop.xlane.xlu0 %797 }
 0x4a0   :  { %v1652_v6 = vsub.f32 %v781_v21, %v798_v5 }
 0x4a1   :  { %v849_v7 = vmul.f32 1.442695, %v1650_v4 }
 0x4a2   :  { %v845_v8 = vmul.f32 1.442695, %v1652_v6  ;;  %v804_v9 = vpop.xlane.xlu1 %803 }
 0x4a3   :  { %1259 = vpow2.f32 %v849_v7  ;;  %v1656_v10 = vsub.f32 %v784_v22, %v804_v9  ;;  %v800_v11 = vpop.xlane.xlu0 %799 }
 0x4a4   :  { %v1658_v12 = vsub.f32 %v782_v24, %v800_v11  ;;  %1261 = vpow2.f32 %v845_v8 }
 0x4a5   :  { %v851_v13 = vmul.f32 1.442695, %v1656_v10 }
 0x4a6   :  { %v847_v14 = vmul.f32 1.442695, %v1658_v12 }
 0x4a7   :  { %1263 = vpow2.f32 %v851_v13  ;;  %v810_v15 = vpop.xlane.xlu0 %809 }
 0x4a8   :  { %v1662_v16 = vsub.f32 %v787_v30, %v810_v15  ;;  %v812_v17 = vpop.xlane.xlu1 %811  ;;  %1265 = vpow2.f32 %v847_v14 }
 0x4a9   :  { %v1664_v18 = vsub.f32 %v788_v33, %v812_v17 }
 0x4aa   :  { %v857_v47 = vmul.f32 1.442695, %v1662_v16 }
 0x4ab   :  { %v859_v48 = vmul.f32 1.442695, %v1664_v18  ;;  %v806_v49 = vpop.xlane.xlu0 %805 }
 0x4ac   :  { %1267 = vpow2.f32 %v857_v47  ;;  %v1668_v19 = vsub.f32 %v785_v35, %v806_v49  ;;  %v808_v50 = vpop.xlane.xlu1 %807 }
 0x4ad   :  { %v1260_v20 = vpop.eup %1259  ;;  %v1670_v51 = vsub.f32 %v786_v38, %v808_v50  ;;  %1269 = vpow2.f32 %v859_v48 }
 0x4ae   :  { %v853_v52 = vmul.f32 1.442695, %v1668_v19  ;;  %881 = vadd.xlane.f32.xlu0 %v1260_v20  ;;  %v1262_v22 = vpop.eup %1261 }
 0x4af   :  { %v855_v53 = vmul.f32 1.442695, %v1670_v51  ;;  %v818_v21 = vpop.xlane.xlu0 %817 }
 0x4b0   :  { %1271 = vpow2.f32 %v853_v52  ;;  %v1674_v23 = vsub.f32 %v791_v42, %v818_v21  ;;  %v820_v24 = vpop.xlane.xlu1 %819 }
 0x4b1   :  { %v1264_v25 = vpop.eup %1263  ;;  %v1676_v26 = vsub.f32 %v792_v45, %v820_v24  ;;  %1273 = vpow2.f32 %v855_v53 }
 0x4b2   :  { %v865_v27 = vmul.f32 1.442695, %v1674_v23  ;;  %883 = vadd.xlane.f32.xlu1 %v1264_v25  ;;  %877 = vadd.xlane.f32.xlu0 %v1262_v22  ;;  %v1266_v32 = vpop.eup %1265 }
 0x4b3   :  { %v867_v28 = vmul.f32 1.442695, %v1676_v26  ;;  %v814_v29 = vpop.xlane.xlu0 %813 }
 0x4b4   :  { %1275 = vpow2.f32 %v865_v27  ;;  %v1681_v30 = vsub.f32 %v1622_v54, %v814_v29  ;;  %v816_v31 = vpop.xlane.xlu1 %815 }
 0x4b5   :  { %v1684_v33 = vsub.f32 %v1627_v57, %v816_v31  ;;  %1277 = vpow2.f32 %v867_v28 }
 0x4b6   :  { %v1268_v34 = vpop.eup %1267  ;;  %v861_v35 = vmul.f32 1.442695, %v1681_v30  ;;  %879 = vadd.xlane.f32.xlu1 %v1266_v32 }
 0x4b7   :  { %v863_v36 = vmul.f32 1.442695, %v1684_v33  ;;  %889 = vadd.xlane.f32.xlu0 %v1268_v34  ;;  %v822_v37 = vpop.xlane.xlu0 %821  ;;  %v1270_v39 = vpop.eup %1269 }
 0x4b8   :  { %1279 = vpow2.f32 %v861_v35  ;;  %v1689_v38 = vsub.f32 %v1632_v63, %v822_v37 }
 0x4b9   :  { %v824_v40 = vpop.xlane.xlu1 %823  ;;  %1281 = vpow2.f32 %v863_v36 }
 0x4ba   :  { %v1272_v41 = vpop.eup %1271  ;;  %v869_v42 = vmul.f32 1.442695, %v1689_v38  ;;  %v1693_v43 = vsub.f32 %v1637_v56, %v824_v40  ;;  %891 = vadd.xlane.f32.xlu1 %v1270_v39 }
 0x4bb   :  { %885 = vadd.xlane.f32.xlu0 %v1272_v41  ;;  %v826_v44 = vpop.xlane.xlu0 %825  ;;  %v1274_v54 = vpop.eup %1273 }
 0x4bc   :  { %1283 = vpow2.f32 %v869_v42  ;;  %v871_v45 = vmul.f32 1.442695, %v1693_v43  ;;  %v1697_v46 = vsub.f32 %v1642_v1, %v826_v44 }
 0x4bd   :  { %v828_v55 = vpop.xlane.xlu1 %827 }
 0x4be   :  { %v1276_v57 = vpop.eup %1275  ;;  %1285 = vpow2.f32 %v871_v45  ;;  %v873_v58 = vmul.f32 1.442695, %v1697_v46  ;;  %v1701_v59 = vsub.f32 %v1647_v2, %v828_v55  ;;  %887 = vadd.xlane.f32.xlu1 %v1274_v54 }
 0x4bf   :  { %897 = vadd.xlane.f32.xlu0 %v1276_v57  ;;  %v1278_v61 = vpop.eup %1277 }
 0x4c0   :  { %1287 = vpow2.f32 %v873_v58  ;;  %v875_v60 = vmul.f32 1.442695, %v1701_v59 }
 0x4c2   :  { %v1280_v62 = vpop.eup %1279  ;;  %1289 = vpow2.f32 %v875_v60  ;;  %899 = vadd.xlane.f32.xlu1 %v1278_v61 }
 0x4c3   :  { %893 = vadd.xlane.f32.xlu0 %v1280_v62  ;;  %v1282_v63 = vpop.eup %1281 }
 0x4c6   :  { %v1284_v0 = vpop.eup %1283  ;;  %895 = vadd.xlane.f32.xlu1 %v1282_v63 }
 0x4c7   :  { %901 = vadd.xlane.f32.xlu0 %v1284_v0 }
 0x4c8   :  { %v1286_v56 = vpop.eup %1285 }
 0x4ca   :  { %v1288_v1 = vpop.eup %1287  ;;  %903 = vadd.xlane.f32.xlu1 %v1286_v56 }
 0x4cb   :  { %905 = vadd.xlane.f32.xlu0 %v1288_v1 }
 0x4cc   :  { %v1290_v2 = vpop.eup %1289 }
 0x4ce   :  { %907 = vadd.xlane.f32.xlu1 %v1290_v2 }
 0x53b   :  { %v882_v3 = vpop.xlane.xlu0 %881 }
 0x53c   :  { %1291 = vlog2.f32 %v882_v3 }
 0x53f   :  { %v884_v5 = vpop.xlane.xlu1 %883  ;;  %v878_v7 = vpop.xlane.xlu0 %877 }
 0x540   :  { %1293 = vlog2.f32 %v884_v5 }
 0x541   :  { %1295 = vlog2.f32 %v878_v7 }
 0x543   :  { %v880_v8 = vpop.xlane.xlu1 %879 }
 0x544   :  { %1297 = vlog2.f32 %v880_v8  ;;  %v890_v9 = vpop.xlane.xlu0 %889 }
 0x545   :  { %1299 = vlog2.f32 %v890_v9 }
 0x546   :  { %v1292_v11 = vpop.eup %1291 }
 0x547   :  { %v914_v13 = vmul.f32 0.6931472, %v1292_v11  ;;  %v892_v14 = vpop.xlane.xlu1 %891 }
 0x548   :  { %1301 = vlog2.f32 %v892_v14  ;;  %v886_v15 = vpop.xlane.xlu0 %885 }
 0x549   :  { %v943_v17 = vsub.f32 %v1650_v4, %v914_v13  ;;  %1303 = vlog2.f32 %v886_v15 }
 0x54a   :  { %v1294_v47 = vpop.eup %1293 }
 0x54b   :  { %v1296_v48 = vpop.eup %1295  ;;  %959 = vst [vmem:[#allocation10 + $0x10] sm:$0xff] %v943_v17  ;;  %v916_v49 = vmul.f32 0.6931472, %v1294_v47  ;;  %v888_v50 = vpop.xlane.xlu1 %887 }
 0x54c   :  { %v910_v20 = vmul.f32 0.6931472, %v1296_v48  ;;  %1305 = vlog2.f32 %v888_v50  ;;  %v898_v52 = vpop.xlane.xlu0 %897 }
 0x54d   :  { %v944_v53 = vsub.f32 %v1656_v10, %v916_v49  ;;  %1307 = vlog2.f32 %v898_v52 }
 0x54e   :  { %v1298_v21 = vpop.eup %1297  ;;  %v941_v22 = vsub.f32 %v1652_v6, %v910_v20 }
 0x54f   :  { %v1300_v24 = vpop.eup %1299  ;;  %960 = vst [vmem:[#allocation10 + $0x18] sm:$0xff] %v944_v53  ;;  %v912_v25 = vmul.f32 0.6931472, %v1298_v21  ;;  %v900_v27 = vpop.xlane.xlu1 %899 }
 0x550   :  { %957 = vst [vmem:[#allocation10] sm:$0xff] %v941_v22  ;;  %v922_v4 = vmul.f32 0.6931472, %v1300_v24  ;;  %1309 = vlog2.f32 %v900_v27  ;;  %v894_v28 = vpop.xlane.xlu0 %893 }
 0x551   :  { %v942_v29 = vsub.f32 %v1658_v12, %v912_v25  ;;  %1311 = vlog2.f32 %v894_v28 }
 0x552   :  { %v1302_v31 = vpop.eup %1301  ;;  %v947_v32 = vsub.f32 %v1662_v16, %v922_v4 }
 0x553   :  { %v1304_v34 = vpop.eup %1303  ;;  %958 = vst [vmem:[#allocation10 + $0x8] sm:$0xff] %v942_v29  ;;  %v924_v10 = vmul.f32 0.6931472, %v1302_v31  ;;  %v896_v35 = vpop.xlane.xlu1 %895 }
 0x554   :  { %963 = vst [vmem:[#allocation10 + $0x30] sm:$0xff] %v947_v32  ;;  %v918_v6 = vmul.f32 0.6931472, %v1304_v34  ;;  %1313 = vlog2.f32 %v896_v35  ;;  %v902_v36 = vpop.xlane.xlu0 %901 }
 0x555   :  { %v948_v37 = vsub.f32 %v1664_v18, %v924_v10  ;;  %1315 = vlog2.f32 %v902_v36 }
 0x556   :  { %v1306_v39 = vpop.eup %1305  ;;  %v945_v40 = vsub.f32 %v1668_v19, %v918_v6 }
 0x557   :  { %v1308_v41 = vpop.eup %1307  ;;  %964 = vst [vmem:[#allocation10 + $0x38] sm:$0xff] %v948_v37  ;;  %v920_v12 = vmul.f32 0.6931472, %v1306_v39  ;;  %v904_v42 = vpop.xlane.xlu1 %903 }
 0x558   :  { %961 = vst [vmem:[#allocation10 + $0x20] sm:$0xff] %v945_v40  ;;  %v930_v16 = vmul.f32 0.6931472, %v1308_v41  ;;  %1317 = vlog2.f32 %v904_v42  ;;  %v906_v44 = vpop.xlane.xlu0 %905 }
 0x559   :  { %v946_v45 = vsub.f32 %v1670_v51, %v920_v12  ;;  %1319 = vlog2.f32 %v906_v44 }
 0x55a   :  { %v1310_v54 = vpop.eup %1309  ;;  %v951_v55 = vsub.f32 %v1674_v23, %v930_v16 }
 0x55b   :  { %v1312_v57 = vpop.eup %1311  ;;  %962 = vst [vmem:[#allocation10 + $0x28] sm:$0xff] %v946_v45  ;;  %v932_v18 = vmul.f32 0.6931472, %v1310_v54  ;;  %v908_v58 = vpop.xlane.xlu1 %907 }
 0x55c   :  { %967 = vst [vmem:[#allocation10 + $0x50] sm:$0xff] %v951_v55  ;;  %v926_v19 = vmul.f32 0.6931472, %v1312_v57  ;;  %1321 = vlog2.f32 %v908_v58 }
 0x55d   :  { %v952_v60 = vsub.f32 %v1676_v26, %v932_v18 }
 0x55e   :  { %v1314_v61 = vpop.eup %1313  ;;  %v949_v62 = vsub.f32 %v1681_v30, %v926_v19 }
 0x55f   :  { %v1316_v63 = vpop.eup %1315  ;;  %968 = vst [vmem:[#allocation10 + $0x58] sm:$0xff] %v952_v60  ;;  %v928_v0 = vmul.f32 0.6931472, %v1314_v61 }
 0x560   :  { %965 = vst [vmem:[#allocation10 + $0x40] sm:$0xff] %v949_v62  ;;  %v934_v51 = vmul.f32 0.6931472, %v1316_v63 }
 0x561   :  { %v950_v56 = vsub.f32 %v1684_v33, %v928_v0 }
 0x562   :  { %v1318_v23 = vpop.eup %1317  ;;  %v953_v1 = vsub.f32 %v1689_v38, %v934_v51 }
 0x563   :  { %v1320_v2 = vpop.eup %1319  ;;  %966 = vst [vmem:[#allocation10 + $0x48] sm:$0xff] %v950_v56  ;;  %v936_v3 = vmul.f32 0.6931472, %v1318_v23 }
 0x564   :  { %969 = vst [vmem:[#allocation10 + $0x60] sm:$0xff] %v953_v1  ;;  %v938_v5 = vmul.f32 0.6931472, %v1320_v2 }
 0x565   :  { %v954_v26 = vsub.f32 %v1693_v43, %v936_v3 }
 0x566   :  { %v1322_v7 = vpop.eup %1321  ;;  %v955_v30 = vsub.f32 %v1697_v46, %v938_v5 }
 0x567   :  { %970 = vst [vmem:[#allocation10 + $0x68] sm:$0xff] %v954_v26  ;;  %v940_v8 = vmul.f32 0.6931472, %v1322_v7 }
 0x568   :  { %971 = vst [vmem:[#allocation10 + $0x70] sm:$0xff] %v955_v30 }
 0x569   :  { %v956_v33 = vsub.f32 %v1701_v59, %v940_v8 }
 0x56b   :  { %972 = vst [vmem:[#allocation10 + $0x78] sm:$0xff] %v956_v33 }
 0x56c   :  { %1422 = shalt.err (!%p1419_p8)
}
 0x56d   :  { %s1423_s26 = scalar_lea.hbm %s1738_s6, 2048 }
 0x56e   :  { %p1424_p9 = scmp.ne.s32.totalorder %s1738_s6, %s1423_s26  ;;  %p1427_p10 = scmp.lt.u32.totalorder %s1423_s26, %s1738_s6 }
 0x570   :  { %p1429_p11 = pnand %p1427_p10, %p1424_p9 }
 0x572   :  { %1432 = shalt.err (!%p1429_p11)
}
 0x573   :  { %s1448_s7 = smov 128   ;;  %s1449_s8 = smov 8  }
 0x574   :  { %984 = dma.vmem_to_hbm [thread:$0]  %s979_s21, 2048, %s1738_s6, [#allocation4], %s1448_s7, %s1448_s7, %s1449_s8  }
 0x575   :  { %1439 = dma.done.wait [#allocation4], 2048  }
 0x576   :  { %1440 = vsyncadd [#allocation4], 4294965248 }
 0x577   :  { %988 = vsyncpa [#allocation3], 1 }
 0x578   :  { %989 = vsyncpa [#allocation6], 1 }
 0x579   :  { %990 = vsyncpa [#allocation9], 1 }
 0x57a   :  { %991 = vsyncpa [#allocation4], 1 }

</bundles_post_ra>
